<compile_context>
chip_gen: v5e
topology: v5e:2x2
jax: 0.10.0
libtpu: 0.0.40
codegen_flags: <defaults>
</compile_context>

<pallas_src>
import functools

import jax
import jax.numpy as jnp
import numpy as np
from jax.experimental import pallas as pl
from jax.experimental.pallas import tpu as pltpu


def _round_up(x, m):
    return ((x + m - 1) // m) * m


def _vmem_limit_bytes():
    """Scoped-VMEM request: physical capacity minus headroom, capped at 96 MiB."""
    try:
        cap = pltpu.get_tpu_info().vmem_capacity_bytes
    except Exception:
        cap = 64 * 1024 * 1024
    return int(max(32 * 1024 * 1024,
                   min(cap - 16 * 1024 * 1024, 96 * 1024 * 1024)))


def _pick_token_tile(T, H, compute_itemsize, min_tile):
    tile = 512
    # With f32 operands at production H, halve the tile so double-buffered x
    # plus the f32 h intermediate comfortably fit v7x's 64 MiB VMEM.
    if compute_itemsize >= 4 and H >= 4096:
        tile = 256
    # Keep the grid at >= 2 steps for small T (overlap + megacore sharding)
    # by shrinking the tile instead of padding everything into one tile.
    while tile > min_tile and T <= tile:
        tile //= 2
    return max(tile, min_tile)


def _glam_router_kernel(x_ref, w1_ref, b1_ref, w2_ref, b2_ref, temp_ref,
                        gs_ref, rw_ref, se_ref, *, num_experts, top_k):
    """One token-tile of the GLaM router.

    x_ref  : (TT, H)      token tile, compute dtype (bf16 on the fast path)
    w1_ref : (H, H4)      gate layer-1 weight (transposed vs torch)
    b1_ref : (1, H4)      f32
    w2_ref : (H4, E_pad)  gate layer-2 weight, columns zero-padded to E_pad
    b2_ref : (1, E_pad)   f32, zero-padded
    temp_ref: (1,) SMEM   learned temperature
    gs_ref : (TT, E_pad)  f32 gate scores (lane-dense, full-width stores)
    rw_ref : (TT, K)      f32 top-k routing weights
    se_ref : (TT, K)      i32 top-k expert indices
    """
    x = x_ref[...]

    # --- gate MLP: Linear -> ReLU -> Linear (bf16 MXU operands, f32 accum) ---
    h = jnp.dot(x, w1_ref[...], preferred_element_type=jnp.float32) + b1_ref[...]
    h = jnp.maximum(h, 0.0).astype(x.dtype)          # back to MXU operand dtype
    logits = jnp.dot(h, w2_ref[...],
                     preferred_element_type=jnp.float32) + b2_ref[...]

    # --- temperature: one scalar reciprocal + vector multiply ---
    logits = logits * (1.0 / temp_ref[0])            # (TT, E_pad) f32

    # gate_scores: E_pad is a multiple of 128 -> unmasked full-width stores,
    # no in-register slab assembly.
    gs_ref[...] = logits.astype(gs_ref.dtype)

    # --- softmax over the real experts only (pad lanes -> -inf -> exp 0) ---
    lane = jax.lax.broadcasted_iota(jnp.int32, logits.shape, 1)
    valid = lane < num_experts
    masked_logits = jnp.where(valid, logits, -jnp.inf)
    m = jnp.max(masked_logits, axis=-1, keepdims=True)
    e = jnp.exp(masked_logits - m)
    denom = jnp.sum(e, axis=-1, keepdims=True)
    # TODO(synk): switch to approx=False (still on the EUP) if these probs feed
    # an auxiliary load-balancing / z-loss term that needs exact softmax mass.
    probs = e * pl.reciprocal(denom, approx=True)

    # --- top-k (k tiny & static): iterative argmax + mask.  Rides on VPU/XLU
    # slots that are idle while the MXU streams the H x H4 matmul. ---
    masked = jnp.where(valid, probs, -1.0)           # pad lanes can never win
    weights, indices = [], []
    for _ in range(top_k):
        mx = jnp.max(masked, axis=-1, keepdims=True)              # (TT, 1)
        is_max = masked == mx
        # lowest index among ties (matches jax.lax.top_k / torch.topk)
        idx = jnp.min(jnp.where(is_max, lane, logits.shape[-1]),
                      axis=-1, keepdims=True)                     # (TT, 1) i32
        weights.append(mx)
        indices.append(idx)
        masked = jnp.where(lane == idx, -1.0, masked)

    rw_ref[...] = jnp.concatenate(weights, axis=-1).astype(rw_ref.dtype)
    se_ref[...] = jnp.concatenate(indices, axis=-1)


def glam_router(hidden_states, w1, b1, w2, b2, temperature,
                *, num_experts_per_tok=2, token_tile=None,
                compute_dtype=jnp.bfloat16):
    """hidden_states: (B, S, H).  Returns (routing_weights, selected_experts,
    gate_scores) with shapes (T, k), (T, k), (T, E), T = B*S — same as torch.

    Weights are expected in (in, out) layout (transposed vs torch Linear).
    x / W1 / W2 are cast to `compute_dtype` (default bf16) for the MXU path;
    accumulation stays f32.
    """
    B, S, H = hidden_states.shape
    T = B * S
    H4 = w1.shape[1]
    E = w2.shape[1]
    K = num_experts_per_tok
    E_pad = max(128, _round_up(E, 128))

    itemsize = jnp.dtype(compute_dtype).itemsize
    min_tile = 16 if itemsize < 4 else 8     # bf16 packs 16 sublanes per vreg

    if token_tile is None:
        token_tile = _pick_token_tile(T, H, itemsize, min_tile)
    assert token_tile % min_tile == 0, (
        f"token_tile must be a multiple of {min_tile} for {compute_dtype}")

    # Pad tokens up to a tile multiple so large tiles work for any (B, S).
    T_pad = _round_up(max(T, token_tile), token_tile)
    x_flat = hidden_states.reshape(T, H).astype(compute_dtype)
    if T_pad != T:
        x_flat = jnp.pad(x_flat, ((0, T_pad - T), (0, 0)))

    # Cast weights to the MXU operand dtype; keep biases f32 (added to the
    # f32 accumulator).  Pad W2/b2 columns so E_pad is a 128-lane multiple.
    w1c = w1.astype(compute_dtype)
    w2c = w2.astype(compute_dtype)
    b1p = b1.astype(jnp.float32)
    b2p = b2.astype(jnp.float32)
    if E_pad != E:
        w2c = jnp.pad(w2c, ((0, 0), (0, E_pad - E)))
        b2p = jnp.pad(b2p, ((0, 0), (0, E_pad - E)))
    temp = temperature.astype(jnp.float32)

    grid = (T_pad // token_tile,)
    kernel = functools.partial(_glam_router_kernel, num_experts=E, top_k=K)

    # Constant-index weight/bias blocks: single-buffer them (Buffered(1)) —
    # double-buffering a 16 MiB W1 is pure dead VMEM on v7x.
    # TODO(synk): if profiling shows the x-tile DMA exposed in a small-H
    # memory-bound config, bump the x spec to pipeline_mode=pl.Buffered(3).
    weight_buf = pl.Buffered(1)

    gs_pad, rw_pad, se_pad = pl.pallas_call(
        kernel,
        out_shape=(
            jax.ShapeDtypeStruct((T_pad, E_pad), jnp.float32),
            jax.ShapeDtypeStruct((T_pad, K), jnp.float32),
            jax.ShapeDtypeStruct((T_pad, K), jnp.int32),
        ),
        grid_spec=pltpu.PrefetchScalarGridSpec(
            num_scalar_prefetch=0,
            grid=grid,
            in_specs=[
                pl.BlockSpec((token_tile, H), lambda i: (i, 0)),     # x tile
                pl.BlockSpec((H, H4), lambda i: (0, 0),
                             pipeline_mode=weight_buf),              # W1
                pl.BlockSpec((1, H4), lambda i: (0, 0),
                             pipeline_mode=weight_buf),              # b1
                pl.BlockSpec((H4, E_pad), lambda i: (0, 0),
                             pipeline_mode=weight_buf),              # W2
                pl.BlockSpec((1, E_pad), lambda i: (0, 0),
                             pipeline_mode=weight_buf),              # b2
                pl.BlockSpec(memory_space=pltpu.MemorySpace.SMEM),   # temperature
            ],
            out_specs=[
                pl.BlockSpec((token_tile, E_pad), lambda i: (i, 0)),  # gate_scores
                pl.BlockSpec((token_tile, K), lambda i: (i, 0)),      # routing_weights
                pl.BlockSpec((token_tile, K), lambda i: (i, 0)),      # selected_experts
            ],
        ),
        compiler_params=pltpu.CompilerParams(
            dimension_semantics=("parallel",),
            vmem_limit_bytes=_vmem_limit_bytes(),
        ),
    )(x_flat, w1c, b1p, w2c, b2p, temp)

    routing_weights = rw_pad[:T]
    selected_experts = se_pad[:T]
    gate_scores = gs_pad[:T, :E]
    return routing_weights, selected_experts, gate_scores


def _reference(hidden_states, w1, b1, w2, b2, temperature, k, compute_dtype):
    """Plain-JAX reference using the same operand quantization as the kernel."""
    B, S, H = hidden_states.shape
    x = hidden_states.reshape(-1, H).astype(compute_dtype).astype(jnp.float32)
    w1q = w1.astype(compute_dtype).astype(jnp.float32)
    w2q = w2.astype(compute_dtype).astype(jnp.float32)
    h = jnp.maximum(x @ w1q + b1.astype(jnp.float32), 0.0)
    h = h.astype(compute_dtype).astype(jnp.float32)
    logits = (h @ w2q + b2.astype(jnp.float32)) / temperature[0]
    probs = jax.nn.softmax(logits, axis=-1)
    rw, se = jax.lax.top_k(probs, k)
    return rw, se, logits


if __name__ == "__main__":
    # Small shapes consistent with the module's forward:
    #   hidden_states: (batch=2, seq=8, hidden=32)
    #   gate: Linear(32 -> 8) -> ReLU -> Linear(8 -> num_experts=8), topk k=2
    B, S, H = 2, 8, 32
    E = 8           # num_experts
    K = 2           # num_experts_per_tok
    H4 = H // 4     # gate hidden dim

    key = jax.random.PRNGKey(0)
    k_x, k_w1, k_b1, k_w2, k_b2 = jax.random.split(key, 5)

    hidden_states = jax.random.normal(k_x, (B, S, H), dtype=jnp.float32)

    # Deterministic parameter init (torch Linear weight is (out, in); we store
    # the transposed (in, out) form used directly by the kernel's matmuls).
    w1 = (jax.random.normal(k_w1, (H, H4), dtype=jnp.float32)
          * (1.0 / np.sqrt(H)))
    b1 = (jax.random.normal(k_b1, (1, H4), dtype=jnp.float32)
          * (1.0 / np.sqrt(H)))
    w2 = (jax.random.normal(k_w2, (H4, E), dtype=jnp.float32)
          * (1.0 / np.sqrt(H4)))
    b2 = (jax.random.normal(k_b2, (1, E), dtype=jnp.float32)
          * (1.0 / np.sqrt(H4)))
    temperature = jnp.ones((1,), dtype=jnp.float32)   # nn.Parameter(torch.ones(1))

    rw, se, gs = glam_router(hidden_states, w1, b1, w2, b2, temperature,
                             num_experts_per_tok=K,
                             compute_dtype=jnp.bfloat16)
    jax.block_until_ready((rw, se, gs))

    # Correctness check against a plain-JAX reference that uses the same bf16
    # operand quantization (the kernel accumulates in f32 on the MXU).
    rw_ref, se_ref, gs_ref = _reference(hidden_states, w1, b1, w2, b2,
                                        temperature, K, jnp.bfloat16)
    np.testing.assert_allclose(np.asarray(gs), np.asarray(gs_ref),
                               rtol=1e-3, atol=1e-3)
    # routing weights use the EUP approximate reciprocal -> looser tolerance
    # (the approx recip is a per-row scale, so it cannot change the selected
    # expert indices, which remain exactly equal).
    np.testing.assert_allclose(np.asarray(rw), np.asarray(rw_ref),
                               rtol=1e-2, atol=1e-2)
    np.testing.assert_array_equal(np.asarray(se), np.asarray(se_ref))

    print("KERNEL_OK")
</pallas_src>

<mosaic_0001>
module attributes {stable_mosaic.version = 11 : i64} {
  func.func @_glam_router_kernel(%arg0: i32, %arg1: memref<16x32xbf16, #tpu.memory_space<vmem>>, %arg2: memref<32x8xbf16, #tpu.memory_space<vmem>>, %arg3: memref<1x8xf32, #tpu.memory_space<vmem>>, %arg4: memref<8x128xbf16, #tpu.memory_space<vmem>>, %arg5: memref<1x128xf32, #tpu.memory_space<vmem>>, %arg6: memref<1xf32, #tpu.memory_space<smem>>, %arg7: memref<16x128xf32, #tpu.memory_space<vmem>>, %arg8: memref<16x2xf32, #tpu.memory_space<vmem>>, %arg9: memref<16x2xi32, #tpu.memory_space<vmem>>) attributes {dimension_semantics = [#tpu.dimension_semantics<parallel>], iteration_bounds = array<i64: 1>, scalar_prefetch = 0 : i64, scratch_operands = 0 : i64, tpu.core_type = #tpu.core_type<tc>, window_params = [{transform_indices = @transform_0, window_bounds = array<i64: 16, 32>}, {pipeline_mode = #tpu.pipeline_mode<synchronous>, transform_indices = @transform_1, window_bounds = array<i64: 32, 8>}, {pipeline_mode = #tpu.pipeline_mode<synchronous>, transform_indices = @transform_2, window_bounds = array<i64: 1, 8>}, {pipeline_mode = #tpu.pipeline_mode<synchronous>, transform_indices = @transform_3, window_bounds = array<i64: 8, 128>}, {pipeline_mode = #tpu.pipeline_mode<synchronous>, transform_indices = @transform_4, window_bounds = array<i64: 1, 128>}, {transform_indices = @transform_5, window_bounds = array<i64: 1>}, {transform_indices = @transform_6, window_bounds = array<i64: 16, 128>}, {transform_indices = @transform_7, window_bounds = array<i64: 16, 2>}, {transform_indices = @transform_8, window_bounds = array<i64: 16, 2>}]} {
    %c0 = arith.constant 0 : index
    %c0_0 = arith.constant 0 : index
    %0 = vector.load %arg1[%c0, %c0_0] : memref<16x32xbf16, #tpu.memory_space<vmem>>, vector<16x32xbf16>
    %c0_1 = arith.constant 0 : index
    %c0_2 = arith.constant 0 : index
    %1 = vector.load %arg2[%c0_1, %c0_2] : memref<32x8xbf16, #tpu.memory_space<vmem>>, vector<32x8xbf16>
    %cst = arith.constant dense<0.000000e+00> : vector<16x8xf32>
    %2 = tpu.matmul %0, %1, %cst {dimension_numbers = #tpu.dot_dimension_numbers<[1], [0], [0], [1], [0, 0, 1, 1], [], []>} : vector<16x32xbf16>, vector<32x8xbf16>, vector<16x8xf32> -> vector<16x8xf32>
    %c0_3 = arith.constant 0 : index
    %c0_4 = arith.constant 0 : index
    %3 = vector.load %arg3[%c0_3, %c0_4] : memref<1x8xf32, #tpu.memory_space<vmem>>, vector<1x8xf32>
    %4 = vector.broadcast %3 : vector<1x8xf32> to vector<16x8xf32>
    %5 = arith.addf %2, %4 : vector<16x8xf32>
    %cst_5 = arith.constant 0.000000e+00 : f32
    %6 = vector.broadcast %cst_5 : f32 to vector<16x8xf32>
    %7 = arith.maximumf %5, %6 : vector<16x8xf32>
    %8 = arith.truncf %7 : vector<16x8xf32> to vector<16x8xbf16>
    %c0_6 = arith.constant 0 : index
    %c0_7 = arith.constant 0 : index
    %9 = vector.load %arg4[%c0_6, %c0_7] : memref<8x128xbf16, #tpu.memory_space<vmem>>, vector<8x128xbf16>
    %cst_8 = arith.constant dense<0.000000e+00> : vector<16x128xf32>
    %10 = tpu.matmul %8, %9, %cst_8 {dimension_numbers = #tpu.dot_dimension_numbers<[1], [0], [0], [1], [0, 0, 1, 1], [], []>} : vector<16x8xbf16>, vector<8x128xbf16>, vector<16x128xf32> -> vector<16x128xf32>
    %c0_9 = arith.constant 0 : index
    %c0_10 = arith.constant 0 : index
    %11 = vector.load %arg5[%c0_9, %c0_10] : memref<1x128xf32, #tpu.memory_space<vmem>>, vector<1x128xf32>
    %12 = vector.broadcast %11 : vector<1x128xf32> to vector<16x128xf32>
    %13 = arith.addf %10, %12 : vector<16x128xf32>
    %c0_11 = arith.constant 0 : index
    %14 = memref.load %arg6[%c0_11] : memref<1xf32, #tpu.memory_space<smem>>
    %cst_12 = arith.constant 1.000000e+00 : f32
    %15 = arith.divf %cst_12, %14 : f32
    %16 = vector.broadcast %15 : f32 to vector<16x128xf32>
    %17 = arith.mulf %13, %16 : vector<16x128xf32>
    %c0_13 = arith.constant 0 : index
    %c0_14 = arith.constant 0 : index
    %18 = vector.load %arg7[%c0_13, %c0_14] : memref<16x128xf32, #tpu.memory_space<vmem>>, vector<16x128xf32>
    tpu.vector_store %arg7[%c0_13, %c0_14], %17 {strides = array<i32>} : memref<16x128xf32, #tpu.memory_space<vmem>>, vector<16x128xf32>,
    %19 = tpu.iota {dimensions = array<i32: 1>} : vector<16x128xi32>
    %c8_i32 = arith.constant 8 : i32
    %20 = vector.broadcast %c8_i32 : i32 to vector<16x128xi32>
    %21 = arith.cmpi slt, %19, %20 : vector<16x128xi32>
    %cst_15 = arith.constant 0xFF800000 : f32
    %22 = vector.broadcast %cst_15 : f32 to vector<16x128xf32>
    %23 = arith.select %21, %17, %22 : vector<16x128xi1>, vector<16x128xf32>
    %cst_16 = arith.constant dense<0xFF800000> : vector<16xf32>
    %24 = vector.multi_reduction <maximumf>, %23, %cst_16 [1] : vector<16x128xf32> to vector<16xf32>
    %25 = vector.shape_cast %24 : vector<16xf32> to vector<16x1xf32>
    %26 = vector.broadcast %25 : vector<16x1xf32> to vector<16x128xf32>
    %27 = arith.subf %23, %26 : vector<16x128xf32>
    %28 = math.exp %27 : vector<16x128xf32>
    %cst_17 = arith.constant dense<0.000000e+00> : vector<16xf32>
    %29 = vector.multi_reduction <add>, %28, %cst_17 [1] : vector<16x128xf32> to vector<16xf32>
    %30 = vector.shape_cast %29 : vector<16xf32> to vector<16x1xf32>
    %31 = tpu.reciprocal %30 {approx = true} : vector<16x1xf32> -> vector<16x1xf32>
    %32 = vector.broadcast %31 : vector<16x1xf32> to vector<16x128xf32>
    %33 = arith.mulf %28, %32 : vector<16x128xf32>
    %cst_18 = arith.constant -1.000000e+00 : f32
    %34 = vector.broadcast %cst_18 : f32 to vector<16x128xf32>
    %35 = arith.select %21, %33, %34 : vector<16x128xi1>, vector<16x128xf32>
    %cst_19 = arith.constant dense<0xFF800000> : vector<16xf32>
    %36 = vector.multi_reduction <maximumf>, %35, %cst_19 [1] : vector<16x128xf32> to vector<16xf32>
    %37 = vector.shape_cast %36 : vector<16xf32> to vector<16x1xf32>
    %38 = vector.broadcast %37 : vector<16x1xf32> to vector<16x128xf32>
    %39 = arith.cmpf oeq, %35, %38 : vector<16x128xf32>
    %c128_i32 = arith.constant 128 : i32
    %40 = vector.broadcast %c128_i32 : i32 to vector<16x128xi32>
    %41 = arith.select %39, %19, %40 : vector<16x128xi1>, vector<16x128xi32>
    %cst_20 = arith.constant dense<2147483647> : vector<16xi32>
    %42 = vector.multi_reduction <minsi>, %41, %cst_20 [1] : vector<16x128xi32> to vector<16xi32>
    %43 = vector.shape_cast %42 : vector<16xi32> to vector<16x1xi32>
    %44 = vector.broadcast %43 : vector<16x1xi32> to vector<16x128xi32>
    %45 = arith.cmpi eq, %19, %44 : vector<16x128xi32>
    %cst_21 = arith.constant -1.000000e+00 : f32
    %46 = vector.broadcast %cst_21 : f32 to vector<16x128xf32>
    %47 = arith.select %45, %46, %35 : vector<16x128xi1>, vector<16x128xf32>
    %cst_22 = arith.constant dense<0xFF800000> : vector<16xf32>
    %48 = vector.multi_reduction <maximumf>, %47, %cst_22 [1] : vector<16x128xf32> to vector<16xf32>
    %49 = vector.shape_cast %48 : vector<16xf32> to vector<16x1xf32>
    %50 = vector.broadcast %49 : vector<16x1xf32> to vector<16x128xf32>
    %51 = arith.cmpf oeq, %47, %50 : vector<16x128xf32>
    %c128_i32_23 = arith.constant 128 : i32
    %52 = vector.broadcast %c128_i32_23 : i32 to vector<16x128xi32>
    %53 = arith.select %51, %19, %52 : vector<16x128xi1>, vector<16x128xi32>
    %cst_24 = arith.constant dense<2147483647> : vector<16xi32>
    %54 = vector.multi_reduction <minsi>, %53, %cst_24 [1] : vector<16x128xi32> to vector<16xi32>
    %55 = vector.shape_cast %54 : vector<16xi32> to vector<16x1xi32>
    %56 = tpu.concatenate %37, %49 in 1 : vector<16x1xf32>, vector<16x1xf32> -> vector<16x2xf32>
    %c0_25 = arith.constant 0 : index
    %c0_26 = arith.constant 0 : index
    %57 = vector.load %arg8[%c0_25, %c0_26] : memref<16x2xf32, #tpu.memory_space<vmem>>, vector<16x2xf32>
    tpu.vector_store %arg8[%c0_25, %c0_26], %56 {strides = array<i32>} : memref<16x2xf32, #tpu.memory_space<vmem>>, vector<16x2xf32>,
    %58 = tpu.concatenate %43, %55 in 1 : vector<16x1xi32>, vector<16x1xi32> -> vector<16x2xi32>
    %c0_27 = arith.constant 0 : index
    %c0_28 = arith.constant 0 : index
    %59 = vector.load %arg9[%c0_27, %c0_28] : memref<16x2xi32, #tpu.memory_space<vmem>>, vector<16x2xi32>
    tpu.vector_store %arg9[%c0_27, %c0_28], %58 {strides = array<i32>} : memref<16x2xi32, #tpu.memory_space<vmem>>, vector<16x2xi32>,
    return
  }
  func.func @transform_0(%arg0: i32) -> (i32, i32) {
    %c0_i32 = arith.constant 0 : i32
    %c0_i32_0 = arith.constant 0 : i32
    return %arg0, %c0_i32 : i32, i32
  }
  func.func @transform_1(%arg0: i32) -> (i32, i32) {
    %c0_i32 = arith.constant 0 : i32
    %c0_i32_0 = arith.constant 0 : i32
    %c0_i32_1 = arith.constant 0 : i32
    return %c0_i32, %c0_i32_0 : i32, i32
  }
  func.func @transform_2(%arg0: i32) -> (i32, i32) {
    %c0_i32 = arith.constant 0 : i32
    %c0_i32_0 = arith.constant 0 : i32
    %c0_i32_1 = arith.constant 0 : i32
    return %c0_i32, %c0_i32_0 : i32, i32
  }
  func.func @transform_3(%arg0: i32) -> (i32, i32) {
    %c0_i32 = arith.constant 0 : i32
    %c0_i32_0 = arith.constant 0 : i32
    %c0_i32_1 = arith.constant 0 : i32
    return %c0_i32, %c0_i32_0 : i32, i32
  }
  func.func @transform_4(%arg0: i32) -> (i32, i32) {
    %c0_i32 = arith.constant 0 : i32
    %c0_i32_0 = arith.constant 0 : i32
    %c0_i32_1 = arith.constant 0 : i32
    return %c0_i32, %c0_i32_0 : i32, i32
  }
  func.func @transform_5(%arg0: i32) -> i32 {
    %c0_i32 = arith.constant 0 : i32
    %c0_i32_0 = arith.constant 0 : i32
    return %c0_i32 : i32
  }
  func.func @transform_6(%arg0: i32) -> (i32, i32) {
    %c0_i32 = arith.constant 0 : i32
    %c0_i32_0 = arith.constant 0 : i32
    return %arg0, %c0_i32 : i32, i32
  }
  func.func @transform_7(%arg0: i32) -> (i32, i32) {
    %c0_i32 = arith.constant 0 : i32
    %c0_i32_0 = arith.constant 0 : i32
    return %arg0, %c0_i32 : i32, i32
  }
  func.func @transform_8(%arg0: i32) -> (i32, i32) {
    %c0_i32 = arith.constant 0 : i32
    %c0_i32_0 = arith.constant 0 : i32
    return %arg0, %c0_i32 : i32, i32
  }
}

</mosaic_0001>

<bundles_post_ra>
// kernel: tpu_custom_call.1
= control target key start
LH: loop header
LB: loop body
LE: loop exit
PB: predicated region body
PF: predicated region fallthrough
CT: control target
= control target key end

     0   :  { %s432_s0 = inlined_call_operand.vmem [shape: bf16[16,32], index: 0, kind: input, shape index: {}]   ;;  %s433_s1 = inlined_call_operand.vmem [shape: bf16[32,8], index: 1, kind: input, shape index: {}]   ;;  %s434_s2 = inlined_call_operand.vmem [shape: f32[1,8], index: 2, kind: input, shape index: {}]   ;;  %s435_s3 = inlined_call_operand.vmem [shape: bf16[8,128], index: 3, kind: input, shape index: {}]   ;;  %s436_s4 = inlined_call_operand.vmem [shape: f32[1,128], index: 4, kind: input, shape index: {}]   ;;  %s437_s5 = inlined_call_operand.<no memory space> [shape: f32[1], index: 5, kind: input, shape index: {}]   ;;  %s438_s6 = inlined_call_operand.hbm [shape: f32[16,128], index: 6, kind: output, shape index: {0}]   ;;  %s439_s7 = inlined_call_operand.vmem [shape: f32[16,2], index: 7, kind: output, shape index: {1}]   ;;  %s440_s8 = inlined_call_operand.vmem [shape: s32[16,2], index: 8, kind: output, shape index: {2}]  }
   0x1   :  { %v279_v0 = vld [vmem:[%s433_s1 + $0x8] sm:$0xff]  ;;  %v278_v1 = vld [vmem:[%s433_s1] sm:$0xff] }
   0x2   :  { %66 = vmatpush.bf16.msra.mxu0 %v279_v0 }
   0x3   :  { %15 = vsyncpa [#allocation4], 0  ;;  %v277_v2 = vld [vmem:[%s432_s0] sm:$0xff]  ;;  %vm56_vm0 = vcmask 261120   ;;  %vm86_vm1 = vcmask 1043456   ;;  %v105_v5 = vstv %s437_s5  ;;  %vm82_vm6 = vcmask 64512  }
   0x4   :  { %v77_v3 = vld [vmem:[%s435_s3] sm:$0xf]  ;;  %287 = vrcp.f32 %v105_v5  ;;  %v117_v8 = vand.u32 2147483648, %v105_v5  ;;  %vm111_vm2 = vweird.f32 %v105_v5  ;;  %v115_v10 = vand.u32 2147483647, %v105_v5  ;;  %s323_s18 = smov [#allocation3]  }
   0x5   :  { %v88_v4 = vsel %vm86_vm1, %v77_v3, 0  ;;  %v285_v17 = vld [vmem:[%s434_s2] ss:$0 sm:$0xff]  ;;  %v126_v24 = vlaneseq  ;;  %vm227_vm14 = vcmask 7168   ;;  %vm230_vm15 = vcmask 15360   ;;  %s241_s19 = sshll.u32 %s323_s18, 4  ;;  %s242_s19 = int_to_ptr.vmem [resolvable:$true] %s241_s19 }
   0x6   :  { %67 = vmatpush.bf16.msra.mxu0 %v278_v1  ;;  %97 = vmatpush.bf16.msra.mxu1 %v88_v4  ;;  %v118_v12 = vor.u32 1.1754944e-38, %v117_v8  ;;  %vm116_vm5 = vcmp.eq.f32.partialorder %v115_v10, 8.507059e+37  ;;  %v286_v25 = vld [vmem:[%s436_s4] ss:$0 sm:$0xff]  ;;  %s243_s22 = sshll.u32 %s438_s6, 4  ;;  %s324_s23 = smov 128   ;;  %s244_s22 = int_to_ptr.hbm [resolvable:$true] %s243_s22 }
   0x7   :  { %v392_v26 = vand.u32 127, %v126_v24 }
   0x9   :  { %275 = vmatmul.msk.bf16.vlgmr.msra.gmra.mxu0 %vm56_vm0, %v277_v2  ;;  %vm128_vm7 = vcmp.lt.s32.totalorder %v392_v26, 8 }
   0xa   :  { %v288_v6 = vpop.eup %287 }
   0xb   :  { %v107_v7 = vmul.f32 %v288_v6, %v105_v5  ;;  %vm112_vm3 = vweird.f32 %v288_v6 }
   0xc   :  { %vm113_vm4 = vmor %vm111_vm2, %vm112_vm3 }
   0xd   :  { %v108_v9 = vsub.f32 1.0, %v107_v7 }
   0xf   :  { %v109_v11 = vmul.f32 %v288_v6, %v108_v9 }
  0x11   :  { %v110_v13 = vadd.f32 %v288_v6, %v109_v11 }
  0x13   :  { %v114_v14 = vsel %vm113_vm4, %v288_v6, %v110_v13 }
  0x14   :  { %v119_v16 = vsel %vm116_vm5, %v118_v12, %v114_v14 }
  0x15   :  { %280 = vpush %v119_v16 }
  0x46   :  { %s281_s15 = spop %280 }
  0x47   :  { %v121_v28 = vstv %s281_s15 }
  0x86   :  { %v69_v15 = vpop.f32.mrf.mxu0 }
  0x87   :  { %v70_v18 = vadd.f32 %v285_v17, %v69_v15 }
  0x89   :  { %v74_v21 = vmax.f32 %v70_v18, 0.0 }
  0x8e   :  { %v71_v19 = vpop.f32.mrf.mxu0 }
  0x8f   :  { %v72_v20 = vadd.f32 %v285_v17, %v71_v19 }
  0x91   :  { %v75_v22 = vmax.f32 %v72_v20, 0.0 }
  0x93   :  { %v76_v23 = vpack.c.bf16 %v75_v22, %v74_v21 }
  0x95   :  { %276 = vmatmul.msk.bf16.vlgmr.msra.gmra.mxu1 %vm82_vm6, %v76_v23 }
 0x112   :  { %v99_v27 = vpop.f32.mrf.mxu1 }
 0x113   :  { %v100_v29 = vadd.f32 %v286_v25, %v99_v27 }
 0x115   :  { %v122_v30 = vmul.f32 %v121_v28, %v100_v29 }
 0x117   :  { %124 = vst [vmem:[#allocation3] sm:$0xff] %v122_v30  ;;  %v129_v31 = vsel %vm128_vm7, %v122_v30, -inf }
 0x118   :  { %131 = vmax.xlane.f32.xlu0 %v129_v31 }
 0x11a   :  { %v101_v32 = vpop.f32.mrf.mxu1 }
 0x11b   :  { %v102_v33 = vadd.f32 %v286_v25, %v101_v32 }
 0x11d   :  { %v123_v34 = vmul.f32 %v121_v28, %v102_v33 }
 0x11f   :  { %125 = vst [vmem:[#allocation3 + $0x8] sm:$0xff] %v123_v34  ;;  %v130_v35 = vsel %vm128_vm7, %v123_v34, -inf }
 0x120   :  { %133 = vmax.xlane.f32.xlu0 %v130_v35 }
 0x18b   :  { %v132_v36 = vpop.xlane.xlu0 %131 }
 0x18c   :  { %v135_v37 = vsub.f32 %v129_v31, %v132_v36 }
 0x18e   :  { %v137_v38 = vmul.f32 1.442695, %v135_v37 }
 0x190   :  { %289 = vpow2.f32 %v137_v38 }
 0x193   :  { %v134_v39 = vpop.xlane.xlu0 %133 }
 0x194   :  { %v136_v40 = vsub.f32 %v130_v35, %v134_v39 }
 0x196   :  { %v290_v41 = vpop.eup %289  ;;  %v139_v42 = vmul.f32 1.442695, %v136_v40 }
 0x197   :  { %141 = vadd.xlane.f32.xlu1 %v290_v41 }
 0x198   :  { %291 = vpow2.f32 %v139_v42 }
 0x19e   :  { %v292_v43 = vpop.eup %291 }
 0x19f   :  { %143 = vadd.xlane.f32.xlu1 %v292_v43 }
 0x20a   :  { %v142_v44 = vpop.xlane.xlu1 %141 }
 0x20b   :  { %293 = vrcp.f32 %v142_v44 }
 0x211   :  { %v294_v45 = vpop.eup %293 }
 0x212   :  { %v144_v46 = vpop.xlane.xlu1 %143  ;;  %v147_v47 = vmul.f32 %v294_v45, %v290_v41 }
 0x213   :  { %295 = vrcp.f32 %v144_v46 }
 0x214   :  { %v149_v48 = vsel %vm128_vm7, %v147_v47, -1.0 }
 0x215   :  { %151 = vmax.xlane.f32.xlu2 %v149_v48 }
 0x219   :  { %v296_v49 = vpop.eup %295 }
 0x21a   :  { %v148_v50 = vmul.f32 %v296_v49, %v292_v43 }
 0x21c   :  { %v150_v51 = vsel %vm128_vm7, %v148_v50, -1.0 }
 0x21d   :  { %153 = vmax.xlane.f32.xlu2 %v150_v51 }
 0x288   :  { %v152_v52 = vpop.xlane.xlu2 %151 }
 0x289   :  { %vm155_vm8 = vcmp.eq.f32.partialorder %v149_v48, %v152_v52 }
 0x28a   :  { %v157_v53 = vsel %vm155_vm8, %v392_v26, 128 }
 0x28b   :  { %v160_v54 = vshra.s32 %v157_v53, 16  ;;  %v159_v60 = vand.u32 65535, %v157_v53 }
 0x28d   :  { %v162_v55 = vcvt.s32.f32 %v160_v54  ;;  %v161_v62 = vcvt.s32.f32 %v159_v60 }
 0x28f   :  { %163 = vmin.xlane.f32.xlu0 %v162_v55 }
 0x290   :  { %v154_v56 = vpop.xlane.xlu2 %153 }
 0x291   :  { %vm156_vm9 = vcmp.eq.f32.partialorder %v150_v51, %v154_v56 }
 0x292   :  { %v158_v57 = vsel %vm156_vm9, %v392_v26, 128 }
 0x293   :  { %v174_v58 = vshra.s32 %v158_v57, 16  ;;  %v173_v0 = vand.u32 65535, %v158_v57 }
 0x295   :  { %v176_v59 = vcvt.s32.f32 %v174_v58  ;;  %v175_v2 = vcvt.s32.f32 %v173_v0 }
 0x297   :  { %177 = vmin.xlane.f32.xlu1 %v176_v59 }
 0x302   :  { %v164_v61 = vpop.xlane.xlu0 %163 }
 0x303   :  { %vm165_vm10 = vcmp.eq.f32.partialorder %v162_v55, %v164_v61  ;;  %v170_v4 = vcvt.f32.s32 %v164_v61 }
 0x304   :  { %v166_v63 = vsel %vm165_vm10, %v161_v62, inf }
 0x305   :  { %167 = vmin.xlane.f32.xlu2 %v166_v63  ;;  %v171_v6 = vshll.u32 %v170_v4, 16 }
 0x30a   :  { %v178_v1 = vpop.xlane.xlu1 %177 }
 0x30b   :  { %vm179_vm11 = vcmp.eq.f32.partialorder %v176_v59, %v178_v1  ;;  %v184_v9 = vcvt.f32.s32 %v178_v1 }
 0x30c   :  { %v180_v3 = vsel %vm179_vm11, %v175_v2, inf }
 0x30d   :  { %181 = vmin.xlane.f32.xlu0 %v180_v3  ;;  %v185_v12 = vshll.u32 %v184_v9, 16 }
 0x378   :  { %v168_v5 = vpop.xlane.xlu2 %167 }
 0x379   :  { %v169_v7 = vcvt.f32.s32 %v168_v5 }
 0x37b   :  { %v172_v8 = vadd.s32 %v171_v6, %v169_v7 }
 0x37d   :  { %vm187_vm12 = vcmp.eq.s32.totalorder %v392_v26, %v172_v8 }
 0x37e   :  { %v189_v10 = vsel %vm187_vm12, -1.0, %v149_v48 }
 0x37f   :  { %191 = vmax.xlane.f32.xlu1 %v189_v10 }
 0x380   :  { %v182_v11 = vpop.xlane.xlu0 %181 }
 0x381   :  { %v183_v13 = vcvt.f32.s32 %v182_v11 }
 0x383   :  { %v186_v14 = vadd.s32 %v185_v12, %v183_v13 }
 0x385   :  { %vm188_vm13 = vcmp.eq.s32.totalorder %v392_v26, %v186_v14 }
 0x386   :  { %v190_v15 = vsel %vm188_vm13, -1.0, %v150_v51 }
 0x387   :  { %193 = vmax.xlane.f32.xlu2 %v190_v15 }
 0x3f2   :  { %v192_v16 = vpop.xlane.xlu1 %191 }
 0x3f3   :  { %vm195_vm0 = vcmp.eq.f32.partialorder %v189_v10, %v192_v16  ;;  %v228_v17 = vsel %vm227_vm14, %v152_v52, %v192_v16 }
 0x3f4   :  { %v197_v18 = vsel %vm195_vm0, %v392_v26, 128  ;;  %231 = vst.msk [vmem:[%s439_s7] sm:$0xff] %vm230_vm15, %v228_v17 }
 0x3f5   :  { %v200_v19 = vshra.s32 %v197_v18, 16  ;;  %v199_v27 = vand.u32 65535, %v197_v18 }
 0x3f7   :  { %v202_v20 = vcvt.s32.f32 %v200_v19  ;;  %v201_v29 = vcvt.s32.f32 %v199_v27 }
 0x3f9   :  { %203 = vmin.xlane.f32.xlu0 %v202_v20 }
 0x3fa   :  { %v194_v21 = vpop.xlane.xlu2 %193 }
 0x3fb   :  { %vm196_vm1 = vcmp.eq.f32.partialorder %v190_v15, %v194_v21  ;;  %v229_v22 = vsel %vm227_vm14, %v154_v56, %v194_v21 }
 0x3fc   :  { %v198_v23 = vsel %vm196_vm1, %v392_v26, 128  ;;  %232 = vst.msk [vmem:[%s439_s7 + $0x8] sm:$0xff] %vm230_vm15, %v229_v22  ;;  %s325_s7 = smov 8  }
 0x3fd   :  { %v214_v24 = vshra.s32 %v198_v23, 16  ;;  %v213_v26 = vand.u32 65535, %v198_v23  ;;  %249 = dma.vmem_to_hbm [thread:$0]  %s242_s19, 256, %s244_s22, [#allocation4], %s324_s23, %s324_s23, %s325_s7  }
 0x3ff   :  { %v216_v25 = vcvt.s32.f32 %v214_v24  ;;  %v215_v32 = vcvt.s32.f32 %v213_v26 }
 0x401   :  { %217 = vmin.xlane.f32.xlu1 %v216_v25 }
 0x46c   :  { %v204_v28 = vpop.xlane.xlu0 %203 }
 0x46d   :  { %vm205_vm2 = vcmp.eq.f32.partialorder %v202_v20, %v204_v28  ;;  %v210_v34 = vcvt.f32.s32 %v204_v28 }
 0x46e   :  { %v206_v30 = vsel %vm205_vm2, %v201_v29, inf }
 0x46f   :  { %207 = vmin.xlane.f32.xlu2 %v206_v30  ;;  %v211_v36 = vshll.u32 %v210_v34, 16 }
 0x474   :  { %v218_v31 = vpop.xlane.xlu1 %217 }
 0x475   :  { %vm219_vm3 = vcmp.eq.f32.partialorder %v216_v25, %v218_v31  ;;  %v224_v39 = vcvt.f32.s32 %v218_v31 }
 0x476   :  { %v220_v33 = vsel %vm219_vm3, %v215_v32, inf }
 0x477   :  { %221 = vmin.xlane.f32.xlu0 %v220_v33  ;;  %v225_v42 = vshll.u32 %v224_v39, 16 }
 0x4e2   :  { %v208_v35 = vpop.xlane.xlu2 %207 }
 0x4e3   :  { %v209_v37 = vcvt.f32.s32 %v208_v35 }
 0x4e5   :  { %v212_v38 = vadd.s32 %v211_v36, %v209_v37 }
 0x4e7   :  { %v233_v40 = vsel %vm227_vm14, %v172_v8, %v212_v38 }
 0x4e8   :  { %235 = vst.msk [vmem:[%s440_s8] sm:$0xff] %vm230_vm15, %v233_v40 }
 0x4ea   :  { %v222_v41 = vpop.xlane.xlu0 %221 }
 0x4eb   :  { %v223_v43 = vcvt.f32.s32 %v222_v41 }
 0x4ed   :  { %v226_v44 = vadd.s32 %v225_v42, %v223_v43 }
 0x4ef   :  { %v234_v45 = vsel %vm227_vm14, %v186_v14, %v226_v44 }
 0x4f0   :  { %236 = vst.msk [vmem:[%s440_s8 + $0x8] sm:$0xff] %vm230_vm15, %v234_v45 }
 0x4f1   :  { %321 = dma.done.wait [#allocation4], 256  }
 0x4f2   :  { %322 = vsyncadd [#allocation4], 4294967040 }
 0x4f3   :  { %262 = vsyncpa [#allocation4], 1 }

</bundles_post_ra>
